<compile_context>
chip_gen: v7x
topology: tpu7x:2x2x1
jax: 0.10.0
libtpu: 0.0.40
codegen_flags: <defaults>
</compile_context>

<pallas_src>
import functools

import jax
import jax.numpy as jnp
from jax.experimental import pallas as pl
from jax.experimental.pallas import tpu as pltpu


def gru_cell_kernel(x_ref, h_ref, w_ref, b_ref, o_ref, *, latent_dim):
    L = latent_dim
    x = x_ref[...]                      # (TB, D)  f32
    h = h_ref[...]                      # (TB, L)  f32

    # Single wide matmul: [x | h] @ W_fused + b_fused   -> (TB, 4L) f32 acc.
    xh = jnp.concatenate([x.astype(jnp.bfloat16), h.astype(jnp.bfloat16)], axis=-1)
    g = jnp.dot(xh, w_ref[...], preferred_element_type=jnp.float32) + b_ref[...]

    # Lane-aligned column groups (L % 128 == 0 in practice):
    #   [0:L)    -> hidden-gate pre-activation (x and h parts pre-summed by MXU)
    #   [L:2L)   -> output-gate pre-activation
    #   [2L:3L)  -> memory_gate_x(x)   (x @ wmx + bmx)
    #   [3L:4L)  -> memory_gate_h(h)   (h @ wmh + bmh)
    hidden_state = jax.nn.sigmoid(g[:, :L])
    output_state = jax.nn.sigmoid(g[:, L:2 * L])
    memory_state = g[:, 2 * L:3 * L] + hidden_state * g[:, 3 * L:]

    # h' = output_state * h + (1 - output_state) * tanh(memory)   (all f32)
    o_ref[...] = (
        output_state * h + (1.0 - output_state) * jnp.tanh(memory_state)
    ).astype(o_ref.dtype)


def _pick_batch_tile(B, max_tile=512):
    """Whole batch in one block when it fits (grid=(1,), zero pipeline
    overhead); otherwise 512-row tiles (multiple of 8 sublanes, 4x MXU M)."""
    if B <= max_tile:
        return ((B + 7) // 8) * 8
    return max_tile


def gru_cell(x, h, params, *, batch_tile=None):
    """One GRUCell step. x: (B, D), h: (B, L) -> new h: (B, L)."""
    B, D = x.shape
    _, L = h.shape
    w = params["w_fused"]               # (D+L, 4L) bf16, stored fused at init
    b = params["b_fused"]               # (1, 4L)   f32
    assert w.shape == (D + L, 4 * L) and b.shape == (1, 4 * L)

    TB = batch_tile if batch_tile is not None else _pick_batch_tile(B)
    grid_b = pl.cdiv(B, TB)
    B_pad = grid_b * TB
    if B_pad != B:
        # Pad instead of shrinking the tile: padded rows compute garbage that
        # is sliced off below; keeps the tile at the MXU-friendly size.
        x = jnp.pad(x, ((0, B_pad - B), (0, 0)))
        h = jnp.pad(h, ((0, B_pad - B), (0, 0)))

    kernel = functools.partial(gru_cell_kernel, latent_dim=L)

    # Rough VMEM need: double-buffered activation/output tiles + resident
    # fused weight/bias (default 2x buffered) + headroom.  Raise the scoped
    # limit accordingly (defaults: 16 MiB v5e / 32 MiB v6e, v7x).
    est_vmem = (2 * TB * (D + 2 * L) * 4            # x, h, out tiles (f32)
                + 2 * ((D + L) * 4 * L * 2          # fused bf16 weight
                       + 4 * L * 4))                # fused f32 bias
    vmem_limit = int(min(110 * 2**20, max(32 * 2**20, 2 * est_vmem)))

    x_spec = pl.BlockSpec((TB, D), lambda i: (i, 0))
    h_spec = pl.BlockSpec((TB, L), lambda i: (i, 0))
    # Constant block index -> weight/bias fetched once, VMEM-resident.
    w_spec = pl.BlockSpec((D + L, 4 * L), lambda i: (0, 0))
    b_spec = pl.BlockSpec((1, 4 * L), lambda i: (0, 0))

    out = pl.pallas_call(
        kernel,
        out_shape=jax.ShapeDtypeStruct((B_pad, L), x.dtype),
        grid=(grid_b,),
        in_specs=[x_spec, h_spec, w_spec, b_spec],
        out_specs=h_spec,
        compiler_params=pltpu.CompilerParams(
            dimension_semantics=("parallel",),      # megacore / v7x 2-TC sharding
            vmem_limit_bytes=vmem_limit,
        ),
    )(x, h, w, b)
    return out[:B] if B_pad != B else out


def init_params(key, input_dim, latent_dim):
    """nn.Linear-style init (uniform +/- 1/sqrt(fan_in)).

    Returns both the pre-fused kernel parameters
        w_fused (D+L, 4L) bf16 = [ W_gates | [wmx;0] | [0;wmh] ]
        b_fused (1, 4L)   f32  = [ b_gates |  bmx    |  bmh    ]
    and the raw f32 pieces (transposed vs PyTorch: (in_features, out_features))
    used by the pure-JAX reference.
    """
    D, L = input_dim, latent_dim
    concat_dim = D + L
    k = jax.random.split(key, 6)

    def uniform(kk, shape, fan_in):
        bound = float(fan_in) ** -0.5
        return jax.random.uniform(kk, shape, jnp.float32, -bound, bound)

    # self.w : Linear(concat_dim, 2L)
    w_full = uniform(k[0], (concat_dim, 2 * L), concat_dim)
    b_full = uniform(k[1], (1, 2 * L), concat_dim)
    # memory_gate_x : Linear(D, L); memory_gate_h : Linear(L, L)
    wmx = uniform(k[2], (D, L), D)
    bmx = uniform(k[3], (1, L), D)
    wmh = uniform(k[4], (L, L), L)
    bmh = uniform(k[5], (1, L), L)

    w_fused = jnp.zeros((concat_dim, 4 * L), jnp.float32)
    w_fused = w_fused.at[:, :2 * L].set(w_full)
    w_fused = w_fused.at[:D, 2 * L:3 * L].set(wmx)
    w_fused = w_fused.at[D:, 3 * L:].set(wmh)
    b_fused = jnp.concatenate([b_full, bmx, bmh], axis=1)

    return {
        "w_fused": w_fused.astype(jnp.bfloat16),   # stored bf16: no per-call cast
        "b_fused": b_fused,
        # f32 pieces for the reference / explicit torch mapping.
        "w_full": w_full, "b_full": b_full,
        "wmx": wmx, "bmx": bmx, "wmh": wmh, "bmh": bmh,
    }


def gru_cell_ref(x, h, p):
    """Pure-JAX f32 reference matching the PyTorch forward exactly."""
    L = h.shape[-1]
    xh = jnp.concatenate([x, h], axis=-1)
    fused = jax.nn.sigmoid(xh @ p["w_full"] + p["b_full"])
    hidden_state, output_state = fused[:, :L], fused[:, L:]
    memory = (x @ p["wmx"] + p["bmx"]) + hidden_state * (h @ p["wmh"] + p["bmh"])
    return output_state * h + (1.0 - output_state) * jnp.tanh(memory)


if __name__ == "__main__":
    # 128-aligned feature dims (lane-dense output, lane-aligned gate slices);
    # B=16 fits in ONE batch block -> grid=(1,), no pipeline overhead.
    B, input_dim, latent_dim = 16, 128, 128

    key = jax.random.PRNGKey(0)
    kx, kh, kp = jax.random.split(key, 3)
    x = jax.random.normal(kx, (B, input_dim), jnp.float32)
    h = jax.random.normal(kh, (B, latent_dim), jnp.float32)
    params = init_params(kp, input_dim, latent_dim)

    out = gru_cell(x, h, params)
    jax.block_until_ready(out)

    ref = gru_cell_ref(x, h, params)
    assert out.shape == (B, latent_dim)
    # bf16 matmul operands/weights with f32 accumulation -> loosened tolerance
    # vs the pure-f32 PyTorch math (intentional, documented deviation).
    max_err = float(jnp.max(jnp.abs(out - ref)))
    assert jnp.allclose(out, ref, atol=2e-2, rtol=2e-2), f"mismatch vs ref ({max_err})"

    print("KERNEL_OK")
</pallas_src>

<mosaic_0001>
module attributes {stable_mosaic.version = 11 : i64} {
  func.func @gru_cell_kernel(%arg0: i32, %arg1: memref<16x128xf32, #tpu.memory_space<vmem>>, %arg2: memref<16x128xf32, #tpu.memory_space<vmem>>, %arg3: memref<256x512xbf16, #tpu.memory_space<vmem>>, %arg4: memref<1x512xf32, #tpu.memory_space<vmem>>, %arg5: memref<16x128xf32, #tpu.memory_space<vmem>>) attributes {dimension_semantics = [#tpu.dimension_semantics<parallel>], iteration_bounds = array<i64: 1>, scalar_prefetch = 0 : i64, scratch_operands = 0 : i64, tpu.core_type = #tpu.core_type<tc>, window_params = [{transform_indices = @transform_0, window_bounds = array<i64: 16, 128>}, {transform_indices = @transform_1, window_bounds = array<i64: 16, 128>}, {pipeline_mode = #tpu.pipeline_mode<synchronous>, transform_indices = @transform_2, window_bounds = array<i64: 256, 512>}, {pipeline_mode = #tpu.pipeline_mode<synchronous>, transform_indices = @transform_3, window_bounds = array<i64: 1, 512>}, {transform_indices = @transform_4, window_bounds = array<i64: 16, 128>}]} {
    %c0 = arith.constant 0 : index
    %c0_0 = arith.constant 0 : index
    %0 = vector.load %arg1[%c0, %c0_0] : memref<16x128xf32, #tpu.memory_space<vmem>>, vector<16x128xf32>
    %c0_1 = arith.constant 0 : index
    %c0_2 = arith.constant 0 : index
    %1 = vector.load %arg2[%c0_1, %c0_2] : memref<16x128xf32, #tpu.memory_space<vmem>>, vector<16x128xf32>
    %2 = arith.truncf %0 : vector<16x128xf32> to vector<16x128xbf16>
    %3 = arith.truncf %1 : vector<16x128xf32> to vector<16x128xbf16>
    %4 = tpu.concatenate %2, %3 in 1 : vector<16x128xbf16>, vector<16x128xbf16> -> vector<16x256xbf16>
    %c0_3 = arith.constant 0 : index
    %c0_4 = arith.constant 0 : index
    %5 = vector.load %arg3[%c0_3, %c0_4] : memref<256x512xbf16, #tpu.memory_space<vmem>>, vector<256x512xbf16>
    %cst = arith.constant dense<0.000000e+00> : vector<16x512xf32>
    %6 = tpu.matmul %4, %5, %cst {dimension_numbers = #tpu.dot_dimension_numbers<[1], [0], [0], [1], [0, 0, 1, 1], [], []>} : vector<16x256xbf16>, vector<256x512xbf16>, vector<16x512xf32> -> vector<16x512xf32>
    %c0_5 = arith.constant 0 : index
    %c0_6 = arith.constant 0 : index
    %7 = vector.load %arg4[%c0_5, %c0_6] : memref<1x512xf32, #tpu.memory_space<vmem>>, vector<1x512xf32>
    %8 = vector.broadcast %7 : vector<1x512xf32> to vector<16x512xf32>
    %9 = arith.addf %6, %8 : vector<16x512xf32>
    %10 = vector.extract_strided_slice %9 {offsets = [0, 0], sizes = [16, 128], strides = [1, 1]} : vector<16x512xf32> to vector<16x128xf32>
    %11 = arith.negf %10 : vector<16x128xf32>
    %12 = math.exp %11 : vector<16x128xf32>
    %cst_7 = arith.constant 1.000000e+00 : f32
    %13 = vector.broadcast %cst_7 : f32 to vector<16x128xf32>
    %14 = arith.addf %13, %12 : vector<16x128xf32>
    %15 = arith.divf %13, %14 : vector<16x128xf32>
    %16 = vector.extract_strided_slice %9 {offsets = [0, 128], sizes = [16, 128], strides = [1, 1]} : vector<16x512xf32> to vector<16x128xf32>
    %17 = arith.negf %16 : vector<16x128xf32>
    %18 = math.exp %17 : vector<16x128xf32>
    %cst_8 = arith.constant 1.000000e+00 : f32
    %19 = vector.broadcast %cst_8 : f32 to vector<16x128xf32>
    %20 = arith.addf %19, %18 : vector<16x128xf32>
    %21 = arith.divf %19, %20 : vector<16x128xf32>
    %22 = vector.extract_strided_slice %9 {offsets = [0, 256], sizes = [16, 128], strides = [1, 1]} : vector<16x512xf32> to vector<16x128xf32>
    %23 = vector.extract_strided_slice %9 {offsets = [0, 384], sizes = [16, 128], strides = [1, 1]} : vector<16x512xf32> to vector<16x128xf32>
    %24 = arith.mulf %15, %23 : vector<16x128xf32>
    %25 = arith.addf %22, %24 : vector<16x128xf32>
    %26 = arith.mulf %21, %1 : vector<16x128xf32>
    %cst_9 = arith.constant 1.000000e+00 : f32
    %27 = vector.broadcast %cst_9 : f32 to vector<16x128xf32>
    %28 = arith.subf %27, %21 : vector<16x128xf32>
    %29 = math.tanh %25 : vector<16x128xf32>
    %30 = arith.mulf %28, %29 : vector<16x128xf32>
    %31 = arith.addf %26, %30 : vector<16x128xf32>
    %c0_10 = arith.constant 0 : index
    %c0_11 = arith.constant 0 : index
    %32 = vector.load %arg5[%c0_10, %c0_11] : memref<16x128xf32, #tpu.memory_space<vmem>>, vector<16x128xf32>
    tpu.vector_store %arg5[%c0_10, %c0_11], %31 {strides = array<i32>} : memref<16x128xf32, #tpu.memory_space<vmem>>, vector<16x128xf32>,
    return
  }
  func.func @transform_0(%arg0: i32) -> (i32, i32) {
    %c0_i32 = arith.constant 0 : i32
    %c0_i32_0 = arith.constant 0 : i32
    return %arg0, %c0_i32 : i32, i32
  }
  func.func @transform_1(%arg0: i32) -> (i32, i32) {
    %c0_i32 = arith.constant 0 : i32
    %c0_i32_0 = arith.constant 0 : i32
    return %arg0, %c0_i32 : i32, i32
  }
  func.func @transform_2(%arg0: i32) -> (i32, i32) {
    %c0_i32 = arith.constant 0 : i32
    %c0_i32_0 = arith.constant 0 : i32
    %c0_i32_1 = arith.constant 0 : i32
    return %c0_i32, %c0_i32_0 : i32, i32
  }
  func.func @transform_3(%arg0: i32) -> (i32, i32) {
    %c0_i32 = arith.constant 0 : i32
    %c0_i32_0 = arith.constant 0 : i32
    %c0_i32_1 = arith.constant 0 : i32
    return %c0_i32, %c0_i32_0 : i32, i32
  }
  func.func @transform_4(%arg0: i32) -> (i32, i32) {
    %c0_i32 = arith.constant 0 : i32
    %c0_i32_0 = arith.constant 0 : i32
    return %arg0, %c0_i32 : i32, i32
  }
}

</mosaic_0001>

<bundles_post_ra>
// kernel: tpu_custom_call.1
= control target key start
LH: loop header
LB: loop body
LE: loop exit
PB: predicated region body
PF: predicated region fallthrough
CT: control target
= control target key end

     0   :  { %9 = vsyncpa [#allocation3], 0  ;;  %s1009_s0 = inlined_call_operand.hbm [shape: f32[16,128], index: 0, kind: input, shape index: {}]   ;;  %s1010_s1 = inlined_call_operand.hbm [shape: f32[16,128], index: 1, kind: input, shape index: {}]   ;;  %s1011_s2 = inlined_call_operand.hbm [shape: bf16[256,512], index: 2, kind: input, shape index: {}]   ;;  %s1012_s3 = inlined_call_operand.vmem [shape: f32[1,512], index: 3, kind: input, shape index: {}]   ;;  %s1013_s4 = inlined_call_operand.hbm [shape: f32[16,128], index: 4, kind: output, shape index: {}]  }
   0x1   :  { %10 = vsyncpa [#allocation6], 0 }
   0x2   :  { %11 = vsyncpa [#allocation4], 0  ;;  %s901_s15 = smov [#allocation5]   ;;  %s902_s17 = smov [#allocation2]  }
   0x3   :  { %s29_s16 = sshll.u32 %s901_s15, 4  ;;  %s17_s18 = sshll.u32 %s902_s17, 4  ;;  %s30_s16 = int_to_ptr.vmem [resolvable:$true] %s29_s16  ;;  %s934_s18 = int_to_ptr.vmem [resolvable:$true] %s17_s18 }
   0x4   :  { %s807_s21 = scalar_lea.hbm %s1010_s1, 256 }
   0x5   :  { %p808_p0 = scmp.ne.s32.totalorder %s1010_s1, %s807_s21  ;;  %p811_p1 = scmp.lt.u32.totalorder %s807_s21, %s1010_s1 }
   0x7   :  { %p813_p2 = pnand %p811_p1, %p808_p0 }
   0x9   :  { %816 = shalt.err (!%p813_p2)
}
   0xa   :  { %s817_s26 = scalar_lea.vmem %s30_s16, 256  ;;  %p822_p4 = scmp.lt.s32.totalorder %s30_s16, %s30_s16 }
   0xb   :  { %p818_p3 = scmp.ne.s32.totalorder %s30_s16, %s817_s26  ;;  %p823_p5 = scmp.lt.s32.totalorder %s817_s26, %s817_s26 }
   0xd   :  { %p824_p6 = por %p823_p5, %p822_p4 }
   0xf   :  { %p825_p7 = pnand %p824_p6, %p818_p3 }
  0x11   :  { %828 = shalt.err (!%p825_p7)
}
  0x12   :  { %s903_s27 = smov 128   ;;  %s904_s28 = smov 8  }
  0x13   :  { %35 = dma.hbm_to_vmem [thread:$0]  %s1010_s1, 256, %s30_s16, [#allocation6], %s903_s27, %s903_s27, %s904_s28  }
  0x14   :  { %s829_s7 = scalar_lea.hbm %s1009_s0, 256 }
  0x15   :  { %p830_p8 = scmp.ne.s32.totalorder %s1009_s0, %s829_s7  ;;  %p833_p9 = scmp.lt.u32.totalorder %s829_s7, %s1009_s0 }
  0x17   :  { %p835_p10 = pnand %p833_p9, %p830_p8 }
  0x19   :  { %838 = shalt.err (!%p835_p10)
}
  0x1a   :  { %s839_s12 = scalar_lea.vmem %s934_s18, 256  ;;  %p844_p12 = scmp.lt.s32.totalorder %s934_s18, %s934_s18 }
  0x1b   :  { %p840_p11 = scmp.ne.s32.totalorder %s934_s18, %s839_s12  ;;  %p845_p13 = scmp.lt.s32.totalorder %s839_s12, %s839_s12 }
  0x1d   :  { %p846_p0 = por %p845_p13, %p844_p12 }
  0x1f   :  { %p847_p1 = pnand %p846_p0, %p840_p11 }
  0x21   :  { %850 = shalt.err (!%p847_p1)
}
  0x22   :  { %23 = dma.hbm_to_vmem [thread:$0]  %s1009_s0, 256, %s934_s18, [#allocation3], %s903_s27, %s903_s27, %s904_s28  }
  0x23   :  { %s905_s14 = smov [#allocation7]   ;;  %s851_s19 = scalar_lea.hbm %s1011_s2, 8192 }
  0x24   :  { %s41_s15 = sshll.u32 %s905_s14, 4  ;;  %p852_p2 = scmp.ne.s32.totalorder %s1011_s2, %s851_s19  ;;  %s42_s15 = int_to_ptr.vmem [resolvable:$true] %s41_s15 }
  0x25   :  { %p855_p3 = scmp.lt.u32.totalorder %s851_s19, %s1011_s2 }
  0x27   :  { %p857_p4 = pnand %p855_p3, %p852_p2 }
  0x29   :  { %860 = shalt.err (!%p857_p4)
}
  0x2a   :  { %s861_s24 = scalar_lea.vmem %s42_s15, 8192  ;;  %p866_p6 = scmp.lt.s32.totalorder %s42_s15, %s42_s15 }
  0x2b   :  { %p862_p5 = scmp.ne.s32.totalorder %s42_s15, %s861_s24  ;;  %p867_p7 = scmp.lt.s32.totalorder %s861_s24, %s861_s24 }
  0x2d   :  { %p868_p8 = por %p867_p7, %p866_p6 }
  0x2f   :  { %p869_p9 = pnand %p868_p8, %p862_p5 }
  0x31   :  { %872 = shalt.err (!%p869_p9)
}
  0x32   :  { %s906_s0 = smov 256   ;;  %s907_s18 = smov 16  }
  0x33   :  { %47 = dma.hbm_to_vmem [thread:$0]  %s1011_s2, 8192, %s42_s15, [#allocation6], %s906_s0, %s906_s0, %s907_s18  }
  0x34   :  { %895 = dma.done.wait [#allocation3], 256  }
  0x35   :  { %896 = vsyncadd [#allocation3], 4294967040 }
  0x36   :  { %897 = dma.done.wait [#allocation6], 8448  }
  0x37   :  { %898 = vsyncadd [#allocation6], 4294958848  ;;  %v691_v0 = vld [vmem:[#allocation7 + $0x4] ss:$16 sps:$4 sm:$0xff]   ;;  %v693_v1 = vld [vmem:[#allocation7] ss:$16 sps:$4 sm:$0xff]  }
  0x38   :  { %471 = vmatprep.subr.bf16.mxu0 %v691_v0  ;;  %v694_v2 = vld [vmem:[#allocation7 + $0x24] ss:$16 sps:$4 sm:$0xff]   ;;  %v696_v3 = vld [vmem:[#allocation7 + $0x20] ss:$16 sps:$4 sm:$0xff]   ;;  %v709_v7 = vld [vmem:[#allocation7 + $0xc] ss:$16 sps:$4 sm:$0xff]  }
  0x39   :  { %472 = vmatpush1.bf16.msra.mxu0 %v693_v1  ;;  %v697_v4 = vld [vmem:[#allocation7 + $0x44] ss:$16 sps:$4 sm:$0xff]   ;;  %v699_v5 = vld [vmem:[#allocation7 + $0x40] ss:$16 sps:$4 sm:$0xff]   ;;  %v711_v8 = vld [vmem:[#allocation7 + $0x8] ss:$16 sps:$4 sm:$0xff]   ;;  %514 = vmatprep.subr.bf16.mxu1 %v709_v7 }
  0x3a   :  { %473 = vmatprep.subr.bf16.mxu0 %v694_v2  ;;  %v700_v6 = vld [vmem:[#allocation7 + $0x64] ss:$16 sps:$4 sm:$0xff]   ;;  %v702_v9 = vld [vmem:[#allocation7 + $0x60] ss:$16 sps:$4 sm:$0xff]   ;;  %515 = vmatpush1.bf16.msra.mxu1 %v711_v8  ;;  %v715_v10 = vld [vmem:[#allocation7 + $0x2c] ss:$16 sps:$4 sm:$0xff]  }
  0x3b   :  { %v717_v11 = vld [vmem:[#allocation7 + $0x28] ss:$16 sps:$4 sm:$0xff]   ;;  %v703_v12 = vld [vmem:[#allocation7 + $0x84] ss:$16 sps:$4 sm:$0xff]   ;;  %516 = vmatprep.subr.bf16.mxu1 %v715_v10  ;;  %v705_v13 = vld [vmem:[#allocation7 + $0x80] ss:$16 sps:$4 sm:$0xff]  }
  0x3c   :  { %v721_v14 = vld [vmem:[#allocation7 + $0x4c] ss:$16 sps:$4 sm:$0xff]   ;;  %v706_v15 = vld [vmem:[#allocation7 + $0xa4] ss:$16 sps:$4 sm:$0xff]   ;;  %v723_v16 = vld [vmem:[#allocation7 + $0x48] ss:$16 sps:$4 sm:$0xff]  }
  0x3d   :  { %474 = vmatpush1.bf16.msra.mxu0 %v696_v3  ;;  %v727_v17 = vld [vmem:[#allocation7 + $0x6c] ss:$16 sps:$4 sm:$0xff]   ;;  %v708_v18 = vld [vmem:[#allocation7 + $0xa0] ss:$16 sps:$4 sm:$0xff]   ;;  %v712_v19 = vld [vmem:[#allocation7 + $0xc4] ss:$16 sps:$4 sm:$0xff]  }
  0x3e   :  { %475 = vmatprep.subr.bf16.mxu0 %v697_v4  ;;  %517 = vmatpush1.bf16.msra.mxu1 %v717_v11  ;;  %v729_v20 = vld [vmem:[#allocation7 + $0x68] ss:$16 sps:$4 sm:$0xff]   ;;  %v733_v21 = vld [vmem:[#allocation7 + $0x8c] ss:$16 sps:$4 sm:$0xff]   ;;  %v714_v22 = vld [vmem:[#allocation7 + $0xc0] ss:$16 sps:$4 sm:$0xff]  }
  0x3f   :  { %518 = vmatprep.subr.bf16.mxu1 %v721_v14  ;;  %v718_v23 = vld [vmem:[#allocation7 + $0xe4] ss:$16 sps:$4 sm:$0xff]   ;;  %v735_v24 = vld [vmem:[#allocation7 + $0x88] ss:$16 sps:$4 sm:$0xff]   ;;  %v739_v25 = vld [vmem:[#allocation7 + $0xac] ss:$16 sps:$4 sm:$0xff]  }
  0x40   :  { %v720_v26 = vld [vmem:[#allocation7 + $0xe0] ss:$16 sps:$4 sm:$0xff]   ;;  %v724_v27 = vld [vmem:[#allocation7 + $0x104] ss:$16 sps:$4 sm:$0xff]   ;;  %v741_v28 = vld [vmem:[#allocation7 + $0xa8] ss:$16 sps:$4 sm:$0xff]  }
  0x41   :  { %476 = vmatpush1.bf16.msra.mxu0 %v699_v5  ;;  %v745_v29 = vld [vmem:[#allocation7 + $0xcc] ss:$16 sps:$4 sm:$0xff]   ;;  %v726_v30 = vld [vmem:[#allocation7 + $0x100] ss:$16 sps:$4 sm:$0xff]   ;;  %v730_v31 = vld [vmem:[#allocation7 + $0x124] ss:$16 sps:$4 sm:$0xff]  }
  0x42   :  { %477 = vmatprep.subr.bf16.mxu0 %v700_v6  ;;  %519 = vmatpush1.bf16.msra.mxu1 %v723_v16  ;;  %v747_v32 = vld [vmem:[#allocation7 + $0xc8] ss:$16 sps:$4 sm:$0xff]   ;;  %v751_v33 = vld [vmem:[#allocation7 + $0xec] ss:$16 sps:$4 sm:$0xff]   ;;  %v732_v34 = vld [vmem:[#allocation7 + $0x120] ss:$16 sps:$4 sm:$0xff]   ;;  %v131_v6 = vlaneseq }
  0x43   :  { %520 = vmatprep.subr.bf16.mxu1 %v727_v17  ;;  %v753_v35 = vld [vmem:[#allocation7 + $0xe8] ss:$16 sps:$4 sm:$0xff]   ;;  %v983_v36 = vld [vmem:[#allocation5] sm:$0xff]  ;;  %v757_v38 = vld [vmem:[#allocation7 + $0x10c] ss:$16 sps:$4 sm:$0xff]  }
  0x44   :  { %v736_v37 = vld [vmem:[#allocation7 + $0x144] ss:$16 sps:$4 sm:$0xff]   ;;  %v985_v39 = vld [vmem:[#allocation5 + $0x8] sm:$0xff]  ;;  %v738_v41 = vld [vmem:[#allocation7 + $0x140] ss:$16 sps:$4 sm:$0xff]   ;;  %v132_v7 = vshrl.u32 %v131_v6, 7 }
  0x45   :  { %478 = vmatpush1.bf16.msra.mxu0 %v702_v9  ;;  %v64_v40 = vpack.c.bf16 %v985_v39, %v983_v36  ;;  %v742_v42 = vld [vmem:[#allocation7 + $0x164] ss:$16 sps:$4 sm:$0xff]   ;;  %v759_v43 = vld [vmem:[#allocation7 + $0x108] ss:$16 sps:$4 sm:$0xff]   ;;  %v763_v44 = vld [vmem:[#allocation7 + $0x12c] ss:$16 sps:$4 sm:$0xff]  }
  0x46   :  { %479 = vmatprep.subr.bf16.mxu0 %v703_v12  ;;  %521 = vmatpush1.bf16.msra.mxu1 %v729_v20  ;;  %v744_v45 = vld [vmem:[#allocation7 + $0x160] ss:$16 sps:$4 sm:$0xff]   ;;  %v765_v46 = vld [vmem:[#allocation7 + $0x128] ss:$16 sps:$4 sm:$0xff]   ;;  %v748_v47 = vld [vmem:[#allocation7 + $0x184] ss:$16 sps:$4 sm:$0xff]  }
  0x47   :  { %522 = vmatprep.subr.bf16.mxu1 %v733_v21  ;;  %503 = vmatprep.mubr.bf16.mxu0 %v64_v40  ;;  %v769_v48 = vld [vmem:[#allocation7 + $0x14c] ss:$16 sps:$4 sm:$0xff]   ;;  %v750_v49 = vld [vmem:[#allocation7 + $0x180] ss:$16 sps:$4 sm:$0xff]   ;;  %v771_v50 = vld [vmem:[#allocation7 + $0x148] ss:$16 sps:$4 sm:$0xff]  }
  0x48   :  { %546 = vmatprep.mubr.bf16.mxu1 %v64_v40  ;;  %v754_v51 = vld [vmem:[#allocation7 + $0x1a4] ss:$16 sps:$4 sm:$0xff]   ;;  %v772_v52 = vld [vmem:[#allocation7 + $0x16c] ss:$16 sps:$4 sm:$0xff]   ;;  %v756_v53 = vld [vmem:[#allocation7 + $0x1a0] ss:$16 sps:$4 sm:$0xff]  }
  0x49   :  { %480 = vmatpush1.bf16.msra.mxu0 %v705_v13  ;;  %v774_v54 = vld [vmem:[#allocation7 + $0x168] ss:$16 sps:$4 sm:$0xff]   ;;  %v760_v55 = vld [vmem:[#allocation7 + $0x1c4] ss:$16 sps:$4 sm:$0xff]   ;;  %v775_v56 = vld [vmem:[#allocation7 + $0x18c] ss:$16 sps:$4 sm:$0xff]  }
  0x4a   :  { %481 = vmatprep.subr.bf16.mxu0 %v706_v15  ;;  %523 = vmatpush1.bf16.msra.mxu1 %v735_v24  ;;  %v762_v57 = vld [vmem:[#allocation7 + $0x1c0] ss:$16 sps:$4 sm:$0xff]   ;;  %v777_v58 = vld [vmem:[#allocation7 + $0x188] ss:$16 sps:$4 sm:$0xff]   ;;  %v766_v59 = vld [vmem:[#allocation7 + $0x1e4] ss:$16 sps:$4 sm:$0xff]  }
  0x4b   :  { %524 = vmatprep.subr.bf16.mxu1 %v739_v25  ;;  %v778_v60 = vld [vmem:[#allocation7 + $0x1ac] ss:$16 sps:$4 sm:$0xff]   ;;  %v768_v61 = vld [vmem:[#allocation7 + $0x1e0] ss:$16 sps:$4 sm:$0xff]   ;;  %v780_v0 = vld [vmem:[#allocation7 + $0x1a8] ss:$16 sps:$4 sm:$0xff]  }
  0x4c   :  { %v59_v62 = vld [vmem:[#allocation2] sm:$0xff]  ;;  %v60_v63 = vld [vmem:[#allocation2 + $0x8] sm:$0xff]  ;;  %v133_v8 = vsub.s32 0, %v132_v7  ;;  %v137_v10 = vsub.s32 1, %v132_v7 }
  0x4d   :  { %482 = vmatpush1.bf16.msra.mxu0 %v708_v18  ;;  %v781_v1 = vld [vmem:[#allocation7 + $0x1cc] ss:$16 sps:$4 sm:$0xff]   ;;  %v63_v2 = vpack.c.bf16 %v60_v63, %v59_v62  ;;  %v783_v3 = vld [vmem:[#allocation7 + $0x1c8] ss:$16 sps:$4 sm:$0xff]   ;;  %v129_v9 = vld [vmem:[%s1012_s3] sm:$0xf] }
  0x4e   :  { %483 = vmatprep.subr.bf16.mxu0 %v712_v19  ;;  %525 = vmatpush1.bf16.msra.mxu1 %v741_v28  ;;  %v784_v4 = vld [vmem:[#allocation7 + $0x1ec] ss:$16 sps:$4 sm:$0xff]   ;;  %v786_v5 = vld [vmem:[#allocation7 + $0x1e8] ss:$16 sps:$4 sm:$0xff]   ;;  %v134_v11 = vrot.slane %v129_v9, %v133_v8  ;;  %v138_v13 = vrot.slane %v129_v9, %v137_v10  ;;  %s908_s3 = smov [#allocation8]  }
  0x4f   :  { %526 = vmatprep.subr.bf16.mxu1 %v745_v29  ;;  %s602_s30 = sshll.u32 %s908_s3, 4  ;;  %s603_s30 = int_to_ptr.vmem [resolvable:$true] %s602_s30 }
  0x50   :  { %s873_s5 = scalar_lea.vmem %s603_s30, 256  ;;  %p878_p11 = scmp.lt.s32.totalorder %s603_s30, %s603_s30 }
  0x51   :  { %484 = vmatpush1.bf16.msra.mxu0 %v714_v22  ;;  %p874_p10 = scmp.ne.s32.totalorder %s603_s30, %s873_s5  ;;  %p879_p12 = scmp.lt.s32.totalorder %s873_s5, %s873_s5 }
  0x52   :  { %485 = vmatprep.subr.bf16.mxu0 %v718_v23  ;;  %527 = vmatpush1.bf16.msra.mxu1 %v747_v32  ;;  %v145_v32 = vsub.s32 3, %v132_v7 }
  0x53   :  { %528 = vmatprep.subr.bf16.mxu1 %v751_v33  ;;  %p880_p13 = por %p879_p12, %p878_p11 }
  0x55   :  { %486 = vmatpush1.bf16.msra.mxu0 %v720_v26  ;;  %p881_p0 = pnand %p880_p13, %p874_p10 }
  0x56   :  { %487 = vmatprep.subr.bf16.mxu0 %v724_v27  ;;  %529 = vmatpush1.bf16.msra.mxu1 %v753_v35  ;;  %v146_v35 = vrot.slane %v129_v9, %v145_v32 }
  0x57   :  { %530 = vmatprep.subr.bf16.mxu1 %v757_v38 }
  0x59   :  { %488 = vmatpush1.bf16.msra.mxu0 %v726_v30 }
  0x5a   :  { %489 = vmatprep.subr.bf16.mxu0 %v730_v31  ;;  %531 = vmatpush1.bf16.msra.mxu1 %v759_v43 }
  0x5b   :  { %532 = vmatprep.subr.bf16.mxu1 %v763_v44 }
  0x5d   :  { %490 = vmatpush1.bf16.msra.mxu0 %v732_v34  ;;  %v141_v34 = vsub.s32 2, %v132_v7 }
  0x5e   :  { %491 = vmatprep.subr.bf16.mxu0 %v736_v37  ;;  %533 = vmatpush1.bf16.msra.mxu1 %v765_v46 }
  0x5f   :  { %534 = vmatprep.subr.bf16.mxu1 %v769_v48 }
  0x61   :  { %492 = vmatpush1.bf16.msra.mxu0 %v738_v41  ;;  %v142_v41 = vrot.slane %v129_v9, %v141_v34 }
  0x62   :  { %493 = vmatprep.subr.bf16.mxu0 %v742_v42  ;;  %535 = vmatpush1.bf16.msra.mxu1 %v771_v50 }
  0x63   :  { %536 = vmatprep.subr.bf16.mxu1 %v772_v52 }
  0x65   :  { %494 = vmatpush1.bf16.msra.mxu0 %v744_v45 }
  0x66   :  { %495 = vmatprep.subr.bf16.mxu0 %v748_v47  ;;  %537 = vmatpush1.bf16.msra.mxu1 %v774_v54 }
  0x67   :  { %538 = vmatprep.subr.bf16.mxu1 %v775_v56 }
  0x69   :  { %496 = vmatpush1.bf16.msra.mxu0 %v750_v49 }
  0x6a   :  { %497 = vmatprep.subr.bf16.mxu0 %v754_v51  ;;  %539 = vmatpush1.bf16.msra.mxu1 %v777_v58 }
  0x6b   :  { %540 = vmatprep.subr.bf16.mxu1 %v778_v60 }
  0x6d   :  { %498 = vmatpush1.bf16.msra.mxu0 %v756_v53 }
  0x6e   :  { %499 = vmatprep.subr.bf16.mxu0 %v760_v55  ;;  %541 = vmatpush1.bf16.msra.mxu1 %v780_v0 }
  0x6f   :  { %542 = vmatprep.subr.bf16.mxu1 %v781_v1 }
  0x71   :  { %500 = vmatpush1.bf16.msra.mxu0 %v762_v57 }
  0x72   :  { %501 = vmatprep.subr.bf16.mxu0 %v766_v59  ;;  %543 = vmatpush1.bf16.msra.mxu1 %v783_v3 }
  0x73   :  { %544 = vmatprep.subr.bf16.mxu1 %v784_v4 }
  0x75   :  { %502 = vmatpush1.bf16.msra.mxu0 %v768_v61 }
  0x76   :  { %545 = vmatpush1.bf16.msra.mxu1 %v786_v5 }
  0x78   :  { %504 = vmatmul.mubr.bf16.vlgmr.msra.gmra.mrb[0].mxu0 %v63_v2 }
  0x79   :  { %547 = vmatmul.mubr.bf16.vlgmr.msra.gmra.mrb[0].mxu1 %v63_v2 }
 0x14b   :  { %v505_v12 = vpop.f32.mrb[0].mxu0 }
 0x14c   :  { %v506_v14 = vadd.f32 %v505_v12, %v134_v11  ;;  %v507_v15 = vpop.f32.mrb[1].mxu0  ;;  %v548_v24 = vpop.f32.mrb[0].mxu1 }
 0x14d   :  { %v509_v16 = vpop.f32.mrb[2].mxu0  ;;  %v508_v20 = vadd.f32 %v507_v15, %v138_v13  ;;  %v550_v25 = vpop.f32.mrb[1].mxu1  ;;  %v549_v45 = vadd.f32 %v548_v24, %v142_v41 }
 0x14e   :  { %v679_v17 = vmul.f32 -1.442695, %v506_v14  ;;  %v510_v18 = vadd.f32 %v509_v16, %v134_v11  ;;  %v511_v19 = vpop.f32.mrb[3].mxu0  ;;  %v552_v27 = vpop.f32.mrb[2].mxu1  ;;  %v551_v42 = vadd.f32 %v550_v25, %v146_v35 }
 0x14f   :  { %v512_v22 = vadd.f32 %v511_v19, %v138_v13  ;;  %v681_v23 = vmul.f32 -1.442695, %v508_v20  ;;  %v554_v28 = vpop.f32.mrb[3].mxu1  ;;  %v553_v50 = vadd.f32 %v552_v27, %v142_v41 }
 0x150   :  { %787 = vpow2.f32 %v679_v17  ;;  %v680_v21 = vmul.f32 -1.442695, %v510_v18  ;;  %v555_v47 = vadd.f32 %v554_v28, %v146_v35 }
 0x151   :  { %v682_v26 = vmul.f32 -1.442695, %v512_v22 }
 0x152   :  { %789 = vpow2.f32 %v680_v21 }
 0x153   :  { %791 = vpow2.f32 %v681_v23 }
 0x154   :  { %793 = vpow2.f32 %v682_v26 }
 0x15a   :  { %v788_v29 = vpop.eup %787 }
 0x15b   :  { %v563_v30 = vadd.f32 1.0, %v788_v29 }
 0x15c   :  { %v790_v31 = vpop.eup %789 }
 0x15d   :  { %795 = vrcp.f32 %v563_v30  ;;  %v564_v33 = vadd.f32 1.0, %v790_v31  ;;  %v792_v37 = vpop.eup %791 }
 0x15e   :  { %v794_v38 = vpop.eup %793  ;;  %v575_v40 = vadd.f32 1.0, %v792_v37 }
 0x15f   :  { %797 = vrcp.f32 %v564_v33  ;;  %v576_v43 = vadd.f32 1.0, %v794_v38 }
 0x160   :  { %799 = vrcp.f32 %v575_v40 }
 0x161   :  { %801 = vrcp.f32 %v576_v43 }
 0x167   :  { %v796_v44 = vpop.eup %795 }
 0x168   :  { %v581_v46 = vmul.f32 %v796_v44, %v551_v42 }
 0x169   :  { %v798_v48 = vpop.eup %797 }
 0x16a   :  { %v583_v49 = vadd.f32 %v581_v46, %v549_v45  ;;  %v582_v51 = vmul.f32 %v798_v48, %v555_v47  ;;  %v800_v53 = vpop.eup %799 }
 0x16b   :  { %v802_v54 = vpop.eup %801  ;;  %v587_v55 = vsub.f32 1.0, %v800_v53  ;;  %v585_v57 = vmul.f32 %v800_v53, %v983_v36 }
 0x16c   :  { %803 = vtanh.f32 %v583_v49  ;;  %v584_v52 = vadd.f32 %v582_v51, %v553_v50  ;;  %v588_v58 = vsub.f32 1.0, %v802_v54  ;;  %v586_v61 = vmul.f32 %v802_v54, %v985_v39 }
 0x16e   :  { %805 = vtanh.f32 %v584_v52 }
 0x176   :  { %v804_v56 = vpop.eup %803 }
 0x177   :  { %v591_v59 = vmul.f32 %v804_v56, %v587_v55 }
 0x178   :  { %v806_v60 = vpop.eup %805 }
 0x179   :  { %v592_v62 = vmul.f32 %v806_v60, %v588_v58  ;;  %v593_v63 = vadd.f32 %v591_v59, %v585_v57 }
 0x17b   :  { %v594_v0 = vadd.f32 %v592_v62, %v586_v61  ;;  %595 = vst [vmem:[#allocation8] sm:$0xff] %v593_v63 }
 0x17d   :  { %596 = vst [vmem:[#allocation8 + $0x8] sm:$0xff] %v594_v0 }
 0x17e   :  { %884 = shalt.err (!%p881_p0)
}
 0x17f   :  { %s885_s8 = scalar_lea.hbm %s1013_s4, 256 }
 0x180   :  { %p886_p1 = scmp.ne.s32.totalorder %s1013_s4, %s885_s8  ;;  %p889_p2 = scmp.lt.u32.totalorder %s885_s8, %s1013_s4 }
 0x182   :  { %p891_p3 = pnand %p889_p2, %p886_p1 }
 0x184   :  { %894 = shalt.err (!%p891_p3)
}
 0x185   :  { %608 = dma.vmem_to_hbm [thread:$0]  %s603_s30, 256, %s1013_s4, [#allocation4], %s903_s27, %s903_s27, %s904_s28  }
 0x186   :  { %899 = dma.done.wait [#allocation4], 256  }
 0x187   :  { %900 = vsyncadd [#allocation4], 4294967040 }
 0x188   :  { %612 = vsyncpa [#allocation3], 1 }
 0x189   :  { %613 = vsyncpa [#allocation6], 1 }
 0x18a   :  { %614 = vsyncpa [#allocation4], 1 }

</bundles_post_ra>
